<compile_context>
chip_gen: v5e
topology: v5e:2x2
jax: 0.10.0
libtpu: 0.0.40
codegen_flags: <defaults>
</compile_context>

<pallas_src>
import jax
import jax.numpy as jnp
from jax.experimental import pallas as pl
from jax.experimental.pallas import tpu as pltpu

_LANES = 1024             # lane-dense last dim (multiple of 128)
_MAX_ROWS_PER_TILE = 512  # (512, 1024) f32 tile = 2 MiB -> safe on v5e/v6e/v7x


def _swish_poly_kernel(x_ref, o_ref):
    # Compute in f32 regardless of input dtype: keeps precision for the x^4
    # term and avoids emulated low-precision VPU paths on v5e.
    x = x_ref[...].astype(jnp.float32)
    x2 = x * x
    # 0.1198 + 0.5*x + x2*(0.1473 + 0.002012*x2)  (== original polynomial)
    t = 0.1473 + 0.002012 * x2
    o_ref[...] = (0.1198 + 0.5 * x + t * x2).astype(o_ref.dtype)


def _round_up(v, m):
    return -(-v // m) * m


def swish_poly(x):
    """Apply the polynomial Swish approximation elementwise via a Pallas kernel.

    Accepts any shape; the computation is done on a lane-dense (rows, 1024)
    flattened view and reshaped back afterwards.
    """
    orig_shape = x.shape
    orig_dtype = x.dtype
    total = x.size
    if total == 0:
        return x

    lanes = _LANES
    rows = -(-total // lanes)

    itemsize = jnp.dtype(orig_dtype).itemsize
    # Sublane packing granularity: f32 -> 8 rows/vreg, bf16/f16 -> 16, 1B -> 32.
    pack = {4: 8, 2: 16, 1: 32}.get(itemsize, 8)

    # Tile-row selection:
    #  * tiny inputs (rows <= pack): one full-extent block (block dim == array
    #    dim, so the (8,128) rule is satisfied).
    #  * otherwise: pack-aligned tile giving >= 2 grid steps (pipelining + v7x
    #    2-TC sharding), capped at _MAX_ROWS_PER_TILE.
    if rows <= pack:
        tile_rows = rows
    else:
        tile_rows = min(_MAX_ROWS_PER_TILE, _round_up(-(-rows // 2), pack))

    grid = pl.cdiv(rows, tile_rows)  # ragged last row-block is masked by Pallas

    # Pad only to the next multiple of _LANES (<= 1023 elems).  In the common
    # case total % 1024 == 0 this is a no-op: no extra HBM read/write pass.
    padded_total = rows * lanes
    flat = x.reshape(-1)
    if padded_total != total:
        flat = jnp.pad(flat, (0, padded_total - total))
    x2d = flat.reshape(rows, lanes)

    cost = pl.CostEstimate(
        flops=7 * total,
        transcendentals=0,
        bytes_accessed=2 * total * itemsize,
    )

    out2d = pl.pallas_call(
        _swish_poly_kernel,
        out_shape=jax.ShapeDtypeStruct((rows, lanes), orig_dtype),
        grid_spec=pltpu.PrefetchScalarGridSpec(
            num_scalar_prefetch=0,
            grid=(grid,),
            in_specs=[pl.BlockSpec((tile_rows, lanes), lambda i: (i, 0))],
            out_specs=pl.BlockSpec((tile_rows, lanes), lambda i: (i, 0)),
        ),
        compiler_params=pltpu.CompilerParams(
            dimension_semantics=("parallel",),
        ),
        cost_estimate=cost,
    )(x2d)

    out = out2d.reshape(-1)
    if padded_total != total:
        out = out[:total]
    return out.reshape(orig_shape)


if __name__ == "__main__":
    key = jax.random.PRNGKey(0)
    # NCHW input, consistent with typical conv-activation usage.
    x = jax.random.normal(key, (2, 4, 16, 16), dtype=jnp.float32)

    out = jax.block_until_ready(swish_poly(x))

    # Reference check in plain JAX.
    ref = 0.1198 + 0.5 * x + 0.1473 * jnp.power(x, 2) - (-0.002012) * jnp.power(x, 4)
    assert out.shape == x.shape
    assert out.dtype == x.dtype
    assert jnp.allclose(out, ref, atol=1e-5, rtol=1e-5)

    # Larger, non-multiple-of-tile shape: exercises the multi-step "parallel"
    # grid and the ragged last row-block path (no whole-tensor pad/slice).
    x2 = jax.random.normal(jax.random.PRNGKey(1), (3, 7, 37, 129), dtype=jnp.float32)
    out2 = jax.block_until_ready(swish_poly(x2))
    ref2 = 0.1198 + 0.5 * x2 + 0.1473 * jnp.power(x2, 2) - (-0.002012) * jnp.power(x2, 4)
    assert jnp.allclose(out2, ref2, atol=1e-5, rtol=1e-5)

    print("KERNEL_OK")
</pallas_src>

<mosaic_0001>
module attributes {stable_mosaic.version = 11 : i64} {
  func.func @_swish_poly_kernel(%arg0: i32, %arg1: memref<2x1024xf32, #tpu.memory_space<vmem>>, %arg2: memref<2x1024xf32, #tpu.memory_space<vmem>>) attributes {dimension_semantics = [#tpu.dimension_semantics<parallel>], iteration_bounds = array<i64: 1>, scalar_prefetch = 0 : i64, scratch_operands = 0 : i64, tpu.core_type = #tpu.core_type<tc>, window_params = [{transform_indices = @transform_0, window_bounds = array<i64: 2, 1024>}, {transform_indices = @transform_1, window_bounds = array<i64: 2, 1024>}]} {
    %c0 = arith.constant 0 : index
    %c0_0 = arith.constant 0 : index
    %0 = vector.load %arg1[%c0, %c0_0] : memref<2x1024xf32, #tpu.memory_space<vmem>>, vector<2x1024xf32>
    %1 = arith.mulf %0, %0 : vector<2x1024xf32>
    %cst = arith.constant 2.012000e-03 : f32
    %2 = vector.broadcast %cst : f32 to vector<2x1024xf32>
    %3 = arith.mulf %2, %1 : vector<2x1024xf32>
    %cst_1 = arith.constant 1.473000e-01 : f32
    %4 = vector.broadcast %cst_1 : f32 to vector<2x1024xf32>
    %5 = arith.addf %4, %3 : vector<2x1024xf32>
    %cst_2 = arith.constant 5.000000e-01 : f32
    %6 = vector.broadcast %cst_2 : f32 to vector<2x1024xf32>
    %7 = arith.mulf %6, %0 : vector<2x1024xf32>
    %cst_3 = arith.constant 1.198000e-01 : f32
    %8 = vector.broadcast %cst_3 : f32 to vector<2x1024xf32>
    %9 = arith.addf %8, %7 : vector<2x1024xf32>
    %10 = arith.mulf %5, %1 : vector<2x1024xf32>
    %11 = arith.addf %9, %10 : vector<2x1024xf32>
    %c0_4 = arith.constant 0 : index
    %c0_5 = arith.constant 0 : index
    %12 = vector.load %arg2[%c0_4, %c0_5] : memref<2x1024xf32, #tpu.memory_space<vmem>>, vector<2x1024xf32>
    tpu.vector_store %arg2[%c0_4, %c0_5], %11 {strides = array<i32>} : memref<2x1024xf32, #tpu.memory_space<vmem>>, vector<2x1024xf32>,
    return
  }
  func.func @transform_0(%arg0: i32) -> (i32, i32) {
    %c0_i32 = arith.constant 0 : i32
    %c0_i32_0 = arith.constant 0 : i32
    return %arg0, %c0_i32 : i32, i32
  }
  func.func @transform_1(%arg0: i32) -> (i32, i32) {
    %c0_i32 = arith.constant 0 : i32
    %c0_i32_0 = arith.constant 0 : i32
    return %arg0, %c0_i32 : i32, i32
  }
}

</mosaic_0001>

<bundles_post_ra>
// kernel: tpu_custom_call.1
= control target key start
LH: loop header
LB: loop body
LE: loop exit
PB: predicated region body
PF: predicated region fallthrough
CT: control target
= control target key end

     0   :  { %6 = vsyncpa [#allocation3], 0  ;;  %s130_s0 = inlined_call_operand.hbm [shape: f32[2,1024], index: 0, kind: input, shape index: {}]   ;;  %s131_s1 = inlined_call_operand.hbm [shape: f32[2,1024], index: 1, kind: output, shape index: {}]  }
   0x1   :  { %7 = vsyncpa [#allocation4], 0  ;;  %s13_s8 = sshll.u32 %s130_s0, 4  ;;  %s112_s9 = smov [#allocation2]   ;;  %s14_s8 = int_to_ptr.hbm [resolvable:$true] %s13_s8 }
   0x2   :  { %s15_s10 = sshll.u32 %s112_s9, 4  ;;  %s16_s10 = int_to_ptr.vmem [resolvable:$true] %s15_s10 }
   0x3   :  { %18 = dma.hbm_to_vmem [thread:$0]  %s14_s8, 256, %s16_s10, [#allocation3]  }
   0x4   :  { %108 = dma.done.wait [#allocation3], 256  }
   0x5   :  { %109 = vsyncadd [#allocation3], 4294967040  ;;  %v23_v0 = vld [vmem:[#allocation2] sm:$0xff]  ;;  %v24_v1 = vld [vmem:[#allocation2 + $0x8] sm:$0xff]  ;;  %s113_s0 = smov [#allocation5]   ;;  %s48_s14 = sshll.u32 %s131_s1, 4  ;;  %s49_s14 = int_to_ptr.hbm [resolvable:$true] %s48_s14 }
   0x6   :  { %v25_v2 = vmul.f32 %v23_v0, %v23_v0  ;;  %v31_v3 = vmul.f32 0.5, %v23_v0  ;;  %v26_v4 = vmul.f32 %v24_v1, %v24_v1  ;;  %v32_v5 = vmul.f32 0.5, %v24_v1  ;;  %s46_s11 = sshll.u32 %s113_s0, 4  ;;  %s47_s11 = int_to_ptr.vmem [resolvable:$true] %s46_s11 }
   0x8   :  { %v27_v6 = vmul.f32 0.002012, %v25_v2  ;;  %v28_v7 = vmul.f32 0.002012, %v26_v4  ;;  %v33_v8 = vadd.f32 0.1198, %v31_v3 }
   0x9   :  { %v34_v11 = vadd.f32 0.1198, %v32_v5 }
   0xa   :  { %v29_v9 = vadd.f32 0.1473, %v27_v6  ;;  %v30_v10 = vadd.f32 0.1473, %v28_v7 }
   0xc   :  { %v35_v12 = vmul.f32 %v29_v9, %v25_v2  ;;  %v36_v13 = vmul.f32 %v30_v10, %v26_v4 }
   0xe   :  { %v37_v14 = vadd.f32 %v35_v12, %v33_v8  ;;  %v38_v15 = vadd.f32 %v36_v13, %v34_v11 }
  0x10   :  { %39 = vst [vmem:[#allocation5] sm:$0xff] %v37_v14 }
  0x11   :  { %40 = vst [vmem:[#allocation5 + $0x8] sm:$0xff] %v38_v15 }
  0x12   :  { %51 = dma.vmem_to_hbm [thread:$0]  %s47_s11, 256, %s49_s14, [#allocation4]  }
  0x13   :  { %110 = dma.done.wait [#allocation4], 256  }
  0x14   :  { %111 = vsyncadd [#allocation4], 4294967040 }
  0x15   :  { %56 = vsyncpa [#allocation3], 1 }
  0x16   :  { %57 = vsyncpa [#allocation4], 1 }

</bundles_post_ra>
